<compile_context>
chip_gen: v6e
topology: v6e:2x2x1
jax: 0.10.0
libtpu: 0.0.40
codegen_flags: <defaults>
</compile_context>

<pallas_src>
import functools

import jax
import jax.numpy as jnp
import numpy as np
from jax.experimental import pallas as pl
from jax.experimental.pallas import tpu as pltpu


def _round_up(x, m):
    return ((x + m - 1) // m) * m


def _vmem_capacity_bytes():
    try:
        return int(pltpu.get_tpu_info().vmem_capacity_bytes)
    except Exception:
        return 128 * 1024 * 1024


_VMEM_CAP = _vmem_capacity_bytes()
if _VMEM_CAP <= 64 * 1024 * 1024:          # v7x-class: 64 MiB per TensorCore
    _VMEM_LIMIT = 44 * 1024 * 1024
    _FUSE_WEIGHT_BUDGET = 16 * 1024 * 1024
else:                                       # v5e / v6e: 128 MiB
    _VMEM_LIMIT = 96 * 1024 * 1024
    _FUSE_WEIGHT_BUDGET = 40 * 1024 * 1024


def _pick_tile(dim_pad, prefs):
    for p in prefs:
        if dim_pad % p == 0:
            return p
    return dim_pad


def _select_row_tile(n, tm_default):
    """Row tile: never larger than the real row count needs (16 = bf16 sublane
    pack); aim for >=2 row tiles when n >= 32 so dimension_semantics=('parallel',)
    can shard across both v7x TensorCores."""
    n = max(int(n), 1)
    if n <= 16:
        return 16
    half = _round_up(-(-n // 2), 16)
    return min(int(tm_default), half)


# ---------------------------------------------------------------------------
# Fully fused MLP: one pallas_call, grid over row tiles, all layer weights
# resident in VMEM (single-buffered), intermediates never hit HBM.
# ---------------------------------------------------------------------------
def _fused_mlp_kernel(x_ref, *refs):
    o_ref = refs[-1]
    wb_refs = refs[:-1]
    num_layers = len(wb_refs) // 2

    h = x_ref[...].astype(jnp.bfloat16)              # in-kernel cast (free VPU work)
    for l in range(num_layers):
        w = wb_refs[2 * l][...]                      # (k_pad, h_pad) bf16, resident
        b = wb_refs[2 * l + 1][...]                  # (1, h_pad)     f32, resident
        y = jnp.dot(h, w, preferred_element_type=jnp.float32)
        y = jnp.maximum(y + b, 0.0)                  # bias + ReLU in f32
        h = y if l == num_layers - 1 else y.astype(jnp.bfloat16)
    o_ref[...] = h.astype(o_ref.dtype)


def _fused_mlp_call(x_p, ws_p, bs_p, *, tm, vmem_limit):
    n_pad, in_pad = x_p.shape
    out_pad = ws_p[-1].shape[1]

    # Grid-invariant weights/biases: single-buffered (they're DMA'd exactly
    # once), so their VMEM footprint is weight_bytes, not 2x.
    resident = pl.Buffered(1)
    in_specs = [pl.BlockSpec((tm, in_pad), lambda i: (i, 0))]
    flat_args = []
    for w, b in zip(ws_p, bs_p):
        k_pad, h_pad = w.shape
        in_specs.append(pl.BlockSpec((k_pad, h_pad), lambda i: (0, 0),
                                     pipeline_mode=resident))
        in_specs.append(pl.BlockSpec((1, h_pad), lambda i: (0, 0),
                                     pipeline_mode=resident))
        flat_args.extend((w, b))

    flops = 2 * n_pad * sum(int(w.shape[0]) * int(w.shape[1]) for w in ws_p)
    bytes_accessed = (int(x_p.size) * x_p.dtype.itemsize
                      + sum(int(w.size) * 2 + int(b.size) * 4
                            for w, b in zip(ws_p, bs_p))
                      + n_pad * out_pad * 4)

    return pl.pallas_call(
        _fused_mlp_kernel,
        out_shape=jax.ShapeDtypeStruct((n_pad, out_pad), jnp.float32),
        grid_spec=pltpu.PrefetchScalarGridSpec(
            num_scalar_prefetch=0,
            grid=(n_pad // tm,),
            in_specs=in_specs,
            out_specs=pl.BlockSpec((tm, out_pad), lambda i: (i, 0)),
        ),
        compiler_params=pltpu.CompilerParams(
            dimension_semantics=("parallel",),
            vmem_limit_bytes=vmem_limit,
        ),
        cost_estimate=pl.CostEstimate(flops=flops, transcendentals=0,
                                      bytes_accessed=bytes_accessed),
    )(x_p, *flat_args)


# ---------------------------------------------------------------------------
# Fallback: per-layer M/N/K-tiled Linear+ReLU with f32 VMEM accumulator.
# ---------------------------------------------------------------------------
def _linear_relu_tiled_kernel(x_ref, w_ref, b_ref, o_ref, acc_ref):
    k = pl.program_id(2)

    @pl.when(k == 0)
    def _():
        acc_ref[...] = jnp.zeros_like(acc_ref)

    acc_ref[...] += jnp.dot(x_ref[...].astype(jnp.bfloat16), w_ref[...],
                            preferred_element_type=jnp.float32)

    @pl.when(k == pl.num_programs(2) - 1)
    def _():
        o_ref[...] = jnp.maximum(acc_ref[...] + b_ref[...], 0.0).astype(o_ref.dtype)


def _linear_relu_tiled(x_p, w_p, b_p, *, tm, tn, tk, vmem_limit, out_dtype):
    n_pad, k_pad = x_p.shape
    _, o_pad = w_p.shape
    grid = (n_pad // tm, o_pad // tn, k_pad // tk)

    flops = 2 * n_pad * k_pad * o_pad
    bytes_accessed = (n_pad * k_pad * x_p.dtype.itemsize * (o_pad // tn)   # X restreamed per j
                      + k_pad * o_pad * 2 * (n_pad // tm)                  # W restreamed per i
                      + o_pad * 4 + n_pad * o_pad * 4)

    return pl.pallas_call(
        _linear_relu_tiled_kernel,
        out_shape=jax.ShapeDtypeStruct((n_pad, o_pad), out_dtype),
        grid_spec=pltpu.PrefetchScalarGridSpec(
            num_scalar_prefetch=0,
            grid=grid,
            in_specs=[
                pl.BlockSpec((tm, tk), lambda i, j, k: (i, k)),
                pl.BlockSpec((tk, tn), lambda i, j, k: (k, j)),
                pl.BlockSpec((1, tn), lambda i, j, k: (0, j)),
            ],
            out_specs=pl.BlockSpec((tm, tn), lambda i, j, k: (i, j)),
            scratch_shapes=[pltpu.VMEM((tm, tn), jnp.float32)],
        ),
        compiler_params=pltpu.CompilerParams(
            dimension_semantics=("parallel", "parallel", "arbitrary"),
            vmem_limit_bytes=vmem_limit,
        ),
        cost_estimate=pl.CostEstimate(flops=flops, transcendentals=0,
                                      bytes_accessed=bytes_accessed),
    )(x_p, w_p, b_p)


# ---------------------------------------------------------------------------
# Params + wrapper
# ---------------------------------------------------------------------------
def init_mlp_params(key, input_size, num_layers, hidden_size, dtype=jnp.float32):
    """nn.Linear default init: U(-1/sqrt(fan_in), 1/sqrt(fan_in)); weights stored
    as (in_features, out_features) so the kernel computes y = x @ W + b."""
    input_sizes = [input_size] + [hidden_size] * (num_layers - 1)
    output_sizes = [hidden_size] * num_layers
    params = []
    for in_size, out_size in zip(input_sizes, output_sizes):
        key, kw, kb = jax.random.split(key, 3)
        bound = 1.0 / float(np.sqrt(in_size))
        w = jax.random.uniform(kw, (in_size, out_size), dtype, -bound, bound)
        b = jax.random.uniform(kb, (1, out_size), dtype, -bound, bound)
        params.append((w, b))
    return params


def prepare_mlp_params(params):
    """One-time weight prep (hoisted out of the per-call forward): pad every
    feature dim to a multiple of 128 and cast weights to bf16; biases stay f32.
    Returns (prepared_params, out_features)."""
    prepared = []
    for w, b in params:
        k_f, o_f = w.shape
        k_pad, o_pad = _round_up(k_f, 128), _round_up(o_f, 128)
        w_p = jnp.pad(w.astype(jnp.float32),
                      ((0, k_pad - k_f), (0, o_pad - o_f))).astype(jnp.bfloat16)
        b_p = jnp.pad(b.astype(jnp.float32).reshape(1, -1),
                      ((0, 0), (0, o_pad - o_f)))
        prepared.append((w_p, b_p))
    return prepared, int(params[-1][0].shape[1])


@functools.partial(jax.jit, static_argnames=("out_features", "tm", "tn", "tk",
                                             "fuse_weight_budget"))
def mlp_forward(x, prepared_params, *, out_features, tm=256, tn=512, tk=512,
                fuse_weight_budget=_FUSE_WEIGHT_BUDGET):
    """x: (batch, seq, feat) -> (batch, seq, out_features). Eval-mode forward
    (dropout = identity). `prepared_params` comes from prepare_mlp_params."""
    bsz, seq, feat = x.shape
    n = bsz * seq

    ws_p = [w for w, _ in prepared_params]
    bs_p = [b for _, b in prepared_params]
    in_pad = ws_p[0].shape[0]

    weight_bytes = sum(int(np.prod(w.shape)) * 2 for w in ws_p)   # bf16 bytes (static)
    x2 = x.reshape(n, feat)

    if weight_bytes <= fuse_weight_budget:
        # Whole stack in one kernel: intermediates never leave VMEM.
        tm_eff = _select_row_tile(n, tm)
        n_pad = _round_up(n, tm_eff)
        if n_pad == n and in_pad == feat:
            x_p = x2                                  # aligned: no wrapper pad/cast pass
        else:
            x_p = jnp.pad(x2.astype(jnp.float32),
                          ((0, n_pad - n), (0, in_pad - feat))).astype(jnp.bfloat16)
        out_p = _fused_mlp_call(x_p, ws_p, bs_p, tm=tm_eff, vmem_limit=_VMEM_LIMIT)
    else:
        # Per-layer M/N/K-tiled matmul (f32 accumulator) for big weight stacks.
        tm_eff = _select_row_tile(n, max(tm, 512))
        n_pad = _round_up(n, tm_eff)
        h = jnp.pad(x2.astype(jnp.float32),
                    ((0, n_pad - n), (0, in_pad - feat))).astype(jnp.bfloat16)
        for idx, (w_p, b_p) in enumerate(zip(ws_p, bs_p)):
            k_pad, o_pad = w_p.shape
            tk_eff = _pick_tile(k_pad, (tk, 512, 256, 128))
            tn_eff = _pick_tile(o_pad, (tn, 512, 256, 128))
            last = idx == len(ws_p) - 1
            h = _linear_relu_tiled(
                h, w_p, b_p, tm=tm_eff, tn=tn_eff, tk=tk_eff,
                vmem_limit=_VMEM_LIMIT,
                out_dtype=jnp.float32 if last else jnp.bfloat16)
        out_p = h

    out = out_p[:n, :out_features].astype(x.dtype)
    return out.reshape(bsz, seq, out_features)


if __name__ == "__main__":
    # ---- small shapes implied by the module (per-frame features into the MLP)
    batch, seq = 2, 8
    input_size, num_layers, hidden_size, dropout = 32, 2, 32, 0.1  # dropout unused (eval)

    key = jax.random.PRNGKey(0)
    kx, kp = jax.random.split(key)
    x = jax.random.normal(kx, (batch, seq, input_size), jnp.float32)
    params = init_mlp_params(kp, input_size, num_layers, hidden_size)
    prepared, out_features = prepare_mlp_params(params)

    # Fused single-kernel path (adaptive small-n row tile).
    out = mlp_forward(x, prepared, out_features=out_features)
    jax.block_until_ready(out)

    # Per-layer tiled fallback path (forced by a zero fusion budget).
    out_tiled = mlp_forward(x, prepared, out_features=out_features,
                            fuse_weight_budget=0)
    jax.block_until_ready(out_tiled)

    # Pure-JAX f32 reference.
    h = x.reshape(batch * seq, input_size)
    for w, b in params:
        h = jnp.maximum(h @ w + b, 0.0)
    ref = h.reshape(batch, seq, hidden_size)

    assert out.shape == (batch, seq, hidden_size)
    assert bool(jnp.all(out >= 0.0))
    np.testing.assert_allclose(np.asarray(out), np.asarray(ref), rtol=2e-2, atol=2e-2)
    np.testing.assert_allclose(np.asarray(out_tiled), np.asarray(ref), rtol=2e-2, atol=2e-2)

    # ---- aligned shapes: exercises the skip-pad path + >=2 row tiles (megacore)
    b2, s2, f2, h2 = 4, 32, 128, 128
    k2x, k2p = jax.random.split(jax.random.PRNGKey(1))
    x2 = jax.random.normal(k2x, (b2, s2, f2), jnp.float32)
    params2 = init_mlp_params(k2p, f2, 2, h2)
    prepared2, out_features2 = prepare_mlp_params(params2)
    out2 = mlp_forward(x2, prepared2, out_features=out_features2)
    jax.block_until_ready(out2)

    r2 = x2.reshape(b2 * s2, f2)
    for w, b in params2:
        r2 = jnp.maximum(r2 @ w + b, 0.0)
    ref2 = r2.reshape(b2, s2, h2)
    np.testing.assert_allclose(np.asarray(out2), np.asarray(ref2), rtol=2e-2, atol=2e-2)

    print("KERNEL_OK")
</pallas_src>

<mosaic_0001>
module attributes {stable_mosaic.version = 11 : i64} {
  func.func @_fused_mlp_kernel(%arg0: i32, %arg1: memref<16x128xbf16, #tpu.memory_space<vmem>>, %arg2: memref<128x128xbf16, #tpu.memory_space<vmem>>, %arg3: memref<1x128xf32, #tpu.memory_space<vmem>>, %arg4: memref<128x128xbf16, #tpu.memory_space<vmem>>, %arg5: memref<1x128xf32, #tpu.memory_space<vmem>>, %arg6: memref<16x128xf32, #tpu.memory_space<vmem>>) attributes {dimension_semantics = [#tpu.dimension_semantics<parallel>], iteration_bounds = array<i64: 1>, scalar_prefetch = 0 : i64, scratch_operands = 0 : i64, tpu.core_type = #tpu.core_type<tc>, window_params = [{transform_indices = @transform_0, window_bounds = array<i64: 16, 128>}, {pipeline_mode = #tpu.pipeline_mode<synchronous>, transform_indices = @transform_1, window_bounds = array<i64: 128, 128>}, {pipeline_mode = #tpu.pipeline_mode<synchronous>, transform_indices = @transform_2, window_bounds = array<i64: 1, 128>}, {pipeline_mode = #tpu.pipeline_mode<synchronous>, transform_indices = @transform_3, window_bounds = array<i64: 128, 128>}, {pipeline_mode = #tpu.pipeline_mode<synchronous>, transform_indices = @transform_4, window_bounds = array<i64: 1, 128>}, {transform_indices = @transform_5, window_bounds = array<i64: 16, 128>}]} {
    %c0 = arith.constant 0 : index
    %c0_0 = arith.constant 0 : index
    %0 = vector.load %arg1[%c0, %c0_0] : memref<16x128xbf16, #tpu.memory_space<vmem>>, vector<16x128xbf16>
    %c0_1 = arith.constant 0 : index
    %c0_2 = arith.constant 0 : index
    %1 = vector.load %arg2[%c0_1, %c0_2] : memref<128x128xbf16, #tpu.memory_space<vmem>>, vector<128x128xbf16>
    %c0_3 = arith.constant 0 : index
    %c0_4 = arith.constant 0 : index
    %2 = vector.load %arg3[%c0_3, %c0_4] : memref<1x128xf32, #tpu.memory_space<vmem>>, vector<1x128xf32>
    %cst = arith.constant dense<0.000000e+00> : vector<16x128xf32>
    %3 = tpu.matmul %0, %1, %cst {dimension_numbers = #tpu.dot_dimension_numbers<[1], [0], [0], [1], [0, 0, 1, 1], [], []>} : vector<16x128xbf16>, vector<128x128xbf16>, vector<16x128xf32> -> vector<16x128xf32>
    %4 = vector.broadcast %2 : vector<1x128xf32> to vector<16x128xf32>
    %5 = arith.addf %3, %4 : vector<16x128xf32>
    %cst_5 = arith.constant 0.000000e+00 : f32
    %6 = vector.broadcast %cst_5 : f32 to vector<16x128xf32>
    %7 = arith.maximumf %5, %6 : vector<16x128xf32>
    %8 = arith.truncf %7 : vector<16x128xf32> to vector<16x128xbf16>
    %c0_6 = arith.constant 0 : index
    %c0_7 = arith.constant 0 : index
    %9 = vector.load %arg4[%c0_6, %c0_7] : memref<128x128xbf16, #tpu.memory_space<vmem>>, vector<128x128xbf16>
    %c0_8 = arith.constant 0 : index
    %c0_9 = arith.constant 0 : index
    %10 = vector.load %arg5[%c0_8, %c0_9] : memref<1x128xf32, #tpu.memory_space<vmem>>, vector<1x128xf32>
    %cst_10 = arith.constant dense<0.000000e+00> : vector<16x128xf32>
    %11 = tpu.matmul %8, %9, %cst_10 {dimension_numbers = #tpu.dot_dimension_numbers<[1], [0], [0], [1], [0, 0, 1, 1], [], []>} : vector<16x128xbf16>, vector<128x128xbf16>, vector<16x128xf32> -> vector<16x128xf32>
    %12 = vector.broadcast %10 : vector<1x128xf32> to vector<16x128xf32>
    %13 = arith.addf %11, %12 : vector<16x128xf32>
    %cst_11 = arith.constant 0.000000e+00 : f32
    %14 = vector.broadcast %cst_11 : f32 to vector<16x128xf32>
    %15 = arith.maximumf %13, %14 : vector<16x128xf32>
    %c0_12 = arith.constant 0 : index
    %c0_13 = arith.constant 0 : index
    %16 = vector.load %arg6[%c0_12, %c0_13] : memref<16x128xf32, #tpu.memory_space<vmem>>, vector<16x128xf32>
    tpu.vector_store %arg6[%c0_12, %c0_13], %15 {strides = array<i32>} : memref<16x128xf32, #tpu.memory_space<vmem>>, vector<16x128xf32>,
    return
  }
  func.func @transform_0(%arg0: i32) -> (i32, i32) {
    %c0_i32 = arith.constant 0 : i32
    %c0_i32_0 = arith.constant 0 : i32
    return %arg0, %c0_i32 : i32, i32
  }
  func.func @transform_1(%arg0: i32) -> (i32, i32) {
    %c0_i32 = arith.constant 0 : i32
    %c0_i32_0 = arith.constant 0 : i32
    %c0_i32_1 = arith.constant 0 : i32
    return %c0_i32, %c0_i32_0 : i32, i32
  }
  func.func @transform_2(%arg0: i32) -> (i32, i32) {
    %c0_i32 = arith.constant 0 : i32
    %c0_i32_0 = arith.constant 0 : i32
    %c0_i32_1 = arith.constant 0 : i32
    return %c0_i32, %c0_i32_0 : i32, i32
  }
  func.func @transform_3(%arg0: i32) -> (i32, i32) {
    %c0_i32 = arith.constant 0 : i32
    %c0_i32_0 = arith.constant 0 : i32
    %c0_i32_1 = arith.constant 0 : i32
    return %c0_i32, %c0_i32_0 : i32, i32
  }
  func.func @transform_4(%arg0: i32) -> (i32, i32) {
    %c0_i32 = arith.constant 0 : i32
    %c0_i32_0 = arith.constant 0 : i32
    %c0_i32_1 = arith.constant 0 : i32
    return %c0_i32, %c0_i32_0 : i32, i32
  }
  func.func @transform_5(%arg0: i32) -> (i32, i32) {
    %c0_i32 = arith.constant 0 : i32
    %c0_i32_0 = arith.constant 0 : i32
    return %arg0, %c0_i32 : i32, i32
  }
}

</mosaic_0001>

<bundles_post_ra>
// kernel: mlp_forward.1
= control target key start
LH: loop header
LB: loop body
LE: loop exit
PB: predicated region body
PF: predicated region fallthrough
CT: control target
= control target key end

     0   :  { %10 = vsyncpa [#allocation3], 0  ;;  %s495_s0 = inlined_call_operand.vmem [shape: bf16[16,128], index: 0, kind: input, shape index: {}]   ;;  %s496_s1 = inlined_call_operand.hbm [shape: bf16[128,128], index: 1, kind: input, shape index: {}]   ;;  %s497_s2 = inlined_call_operand.vmem [shape: f32[1,128], index: 2, kind: input, shape index: {}]   ;;  %s498_s3 = inlined_call_operand.hbm [shape: bf16[128,128], index: 3, kind: input, shape index: {}]   ;;  %s499_s4 = inlined_call_operand.vmem [shape: f32[1,128], index: 4, kind: input, shape index: {}]   ;;  %s500_s5 = inlined_call_operand.vmem [shape: f32[16,128], index: 5, kind: output, shape index: {}]  }
   0x1   :  { %11 = vsyncpa [#allocation5], 0  ;;  %s438_s18 = smov [#allocation2]  }
   0x2   :  { %s19_s19 = sshll.u32 %s438_s18, 4  ;;  %s20_s19 = int_to_ptr.vmem [resolvable:$true] %s19_s19 }
   0x3   :  { %s402_s20 = scalar_lea.vmem %s20_s19, 1024  ;;  %p407_p1 = scmp.lt.s32.totalorder %s20_s19, %s20_s19 }
   0x4   :  { %p403_p0 = scmp.ne.s32.totalorder %s20_s19, %s402_s20  ;;  %p408_p2 = scmp.lt.s32.totalorder %s402_s20, %s402_s20 }
   0x6   :  { %p409_p3 = por %p408_p2, %p407_p1 }
   0x8   :  { %p410_p4 = pnand %p409_p3, %p403_p0 }
   0xa   :  { %413 = shalt.err (!%p410_p4)
}
   0xb   :  { %s439_s21 = smov 64   ;;  %s440_s22 = smov 4  }
   0xc   :  { %25 = dma.hbm_to_vmem [thread:$0]  %s496_s1, 1024, %s20_s19, [#allocation3], %s439_s21, %s439_s21, %s440_s22  }
   0xd   :  { %s441_s25 = smov [#allocation4]  }
   0xe   :  { %s33_s26 = sshll.u32 %s441_s25, 4  ;;  %s34_s26 = int_to_ptr.vmem [resolvable:$true] %s33_s26 }
   0xf   :  { %s422_s27 = scalar_lea.vmem %s34_s26, 1024  ;;  %p427_p6 = scmp.lt.s32.totalorder %s34_s26, %s34_s26 }
  0x10   :  { %p423_p5 = scmp.ne.s32.totalorder %s34_s26, %s422_s27  ;;  %p428_p7 = scmp.lt.s32.totalorder %s422_s27, %s422_s27 }
  0x12   :  { %p429_p8 = por %p428_p7, %p427_p6 }
  0x14   :  { %p430_p9 = pnand %p429_p8, %p423_p5 }
  0x16   :  { %433 = shalt.err (!%p430_p9)
}
  0x17   :  { %39 = dma.hbm_to_vmem [thread:$0]  %s498_s3, 1024, %s34_s26, [#allocation5], %s439_s21, %s439_s21, %s440_s22  }
  0x18   :  { %434 = dma.done.wait [#allocation3], 1024  }
  0x19   :  { %435 = vsyncadd [#allocation3], 4294966272 }
  0x1a   :  { %436 = dma.done.wait [#allocation5], 1024  }
  0x1b   :  { %437 = vsyncadd [#allocation5], 4294966272  ;;  %v442_v0 = vmov 0.0   ;;  %vm443_vm0 = vmmov 0   ;;  %v377_v1 = vld [vmem:[#allocation2 + $0x38] sm:$0xff]   ;;  %v378_v2 = vld [vmem:[#allocation2 + $0x30] sm:$0xff]  }
  0x1c   :  { %331 = vmatprep.subr.bf16.mxu0 %v442_v0  ;;  %347 = vmatprep.mubr.msk.bf16.mxu0 %vm443_vm0, %v442_v0  ;;  %v379_v3 = vld [vmem:[#allocation2 + $0x28] sm:$0xff]   ;;  %v386_v4 = vld [vmem:[#allocation4 + $0x38] sm:$0xff]   ;;  %v380_v5 = vld [vmem:[#allocation2 + $0x20] sm:$0xff]  }
  0x1d   :  { %351 = vmatprep.subr.bf16.mxu1 %v442_v0  ;;  %367 = vmatprep.mubr.msk.bf16.mxu1 %vm443_vm0, %v442_v0  ;;  %v387_v6 = vld [vmem:[#allocation4 + $0x30] sm:$0xff]   ;;  %v381_v7 = vld [vmem:[#allocation2 + $0x18] sm:$0xff]   ;;  %v388_v8 = vld [vmem:[#allocation4 + $0x28] sm:$0xff]  }
  0x1e   :  { %332 = vmatpush3.bf16.msra.mxu0 %v377_v1  ;;  %352 = vmatpush3.bf16.msra.mxu1 %v386_v4  ;;  %v382_v9 = vld [vmem:[#allocation2 + $0x10] sm:$0xff]   ;;  %v389_v10 = vld [vmem:[#allocation4 + $0x20] sm:$0xff]   ;;  %v383_v11 = vld [vmem:[#allocation2 + $0x8] sm:$0xff]  }
  0x1f   :  { %333 = vmatprep.subr.bf16.mxu0 %v442_v0  ;;  %353 = vmatprep.subr.bf16.mxu1 %v442_v0  ;;  %v390_v12 = vld [vmem:[#allocation4 + $0x18] sm:$0xff]   ;;  %v384_v13 = vld [vmem:[#allocation2] sm:$0xff]   ;;  %v391_v15 = vld [vmem:[#allocation4 + $0x10] sm:$0xff]  }
  0x20   :  { %v385_v14 = vld [vmem:[%s495_s0] sm:$0xff]   ;;  %v392_v16 = vld [vmem:[#allocation4 + $0x8] sm:$0xff]  }
  0x21   :  { %v393_v17 = vld [vmem:[#allocation4] sm:$0xff]  }
  0x22   :  { %334 = vmatpush3.bf16.msra.mxu0 %v378_v2  ;;  %354 = vmatpush3.bf16.msra.mxu1 %v387_v6  ;;  %v294_v18 = vld [vmem:[%s497_s2] ss:$0 sm:$0xff] }
  0x23   :  { %335 = vmatprep.subr.bf16.mxu0 %v442_v0  ;;  %355 = vmatprep.subr.bf16.mxu1 %v442_v0  ;;  %v304_v28 = vld [vmem:[%s499_s4] ss:$0 sm:$0xff] }
  0x26   :  { %336 = vmatpush3.bf16.msra.mxu0 %v379_v3  ;;  %356 = vmatpush3.bf16.msra.mxu1 %v388_v8 }
  0x27   :  { %337 = vmatprep.subr.bf16.mxu0 %v442_v0  ;;  %357 = vmatprep.subr.bf16.mxu1 %v442_v0 }
  0x2a   :  { %338 = vmatpush3.bf16.msra.mxu0 %v380_v5  ;;  %358 = vmatpush3.bf16.msra.mxu1 %v389_v10 }
  0x2b   :  { %339 = vmatprep.subr.bf16.mxu0 %v442_v0  ;;  %359 = vmatprep.subr.bf16.mxu1 %v442_v0 }
  0x2e   :  { %340 = vmatpush3.bf16.msra.mxu0 %v381_v7  ;;  %360 = vmatpush3.bf16.msra.mxu1 %v390_v12 }
  0x2f   :  { %341 = vmatprep.subr.bf16.mxu0 %v442_v0  ;;  %361 = vmatprep.subr.bf16.mxu1 %v442_v0 }
  0x32   :  { %342 = vmatpush3.bf16.msra.mxu0 %v382_v9  ;;  %362 = vmatpush3.bf16.msra.mxu1 %v391_v15 }
  0x33   :  { %343 = vmatprep.subr.bf16.mxu0 %v442_v0  ;;  %363 = vmatprep.subr.bf16.mxu1 %v442_v0 }
  0x36   :  { %344 = vmatpush3.bf16.msra.mxu0 %v383_v11  ;;  %364 = vmatpush3.bf16.msra.mxu1 %v392_v16 }
  0x37   :  { %345 = vmatprep.subr.bf16.mxu0 %v442_v0  ;;  %365 = vmatprep.subr.bf16.mxu1 %v442_v0 }
  0x3a   :  { %346 = vmatpush3.bf16.msra.mxu0 %v384_v13  ;;  %366 = vmatpush3.bf16.msra.mxu1 %v393_v17 }
  0x3d   :  { %348 = vmatmul.mubr.bf16.vlgmr.msra.gmra.mxu0 %v385_v14 }
  0xfd   :  { %v162_v19 = vpop.f32.mrf.mxu0 }
  0xfe   :  { %v163_v21 = vadd.f32 %v294_v18, %v162_v19 }
  0xff   :  { %v349_v20 = vpop.f32.mrf.mxu0 }
 0x100   :  { %v169_v25 = vmax.f32 %v163_v21, 0.0 }
 0x101   :  { %v165_v22 = vpop.f32.mrf.mxu0 }
 0x102   :  { %v166_v23 = vadd.f32 %v294_v18, %v165_v22 }
 0x103   :  { %v350_v24 = vpop.f32.mrf.mxu0 }
 0x104   :  { %v170_v26 = vmax.f32 %v166_v23, 0.0 }
 0x106   :  { %v171_v27 = vpack.c.bf16 %v170_v26, %v169_v25 }
 0x108   :  { %368 = vmatmul.mubr.bf16.vlgmr.msra.gmra.mxu1 %v171_v27 }
 0x1c8   :  { %v277_v29 = vpop.f32.mrf.mxu1 }
 0x1c9   :  { %v278_v30 = vadd.f32 %v304_v28, %v277_v29 }
 0x1ca   :  { %v369_v31 = vpop.f32.mrf.mxu1 }
 0x1cb   :  { %v284_v32 = vmax.f32 %v278_v30, 0.0 }
 0x1cc   :  { %v280_v33 = vpop.f32.mrf.mxu1 }
 0x1cd   :  { %286 = vst [vmem:[%s500_s5] sm:$0xff] %v284_v32  ;;  %v281_v34 = vadd.f32 %v304_v28, %v280_v33 }
 0x1ce   :  { %v370_v35 = vpop.f32.mrf.mxu1 }
 0x1cf   :  { %v285_v36 = vmax.f32 %v281_v34, 0.0 }
 0x1d1   :  { %287 = vst [vmem:[%s500_s5 + $0x8] sm:$0xff] %v285_v36 }
 0x1d2   :  { %292 = vsyncpa [#allocation3], 1 }
 0x1d3   :  { %293 = vsyncpa [#allocation5], 1 }

</bundles_post_ra>
